<compile_context>
chip_gen: v7x
topology: tpu7x:2x2x1
jax: 0.10.0
libtpu: 0.0.40
codegen_flags: <defaults>
</compile_context>

<pallas_src>
import numpy as np
import jax
import jax.numpy as jnp
from jax.experimental import pallas as pl
from jax.experimental.pallas import tpu as pltpu

NUM_ITER = 3


# ---------------------------------------------------------------------------
# Pallas kernel: one folded particle-mixing matmul per (batch, lane-tile) block
# ---------------------------------------------------------------------------
def _group_projection_kernel(a_ref, x_ref, o_ref):
    # a_ref: (N, N)          bf16 folded mixing matrix (cast once at build time)
    # x_ref: (1, N, d_tile)  f32, native [B, N, D] layout (one batch element)
    # o_ref: (1, N, d_tile)  f32
    x = x_ref[0].astype(jnp.bfloat16)  # VPU cast, hidden under DMA (mem-bound)
    o_ref[0] = jnp.dot(
        a_ref[...], x, preferred_element_type=jnp.float32
    ).astype(o_ref.dtype)


def _pick_d_tile(N, D, lane_tile, vmem_budget_bytes):
    """Largest lane tile that is a multiple of 128, divides D, and keeps
    (A bf16 single-buffered + double-buffered f32 in/out blocks) under the
    VMEM budget.  If D is not a multiple of 128, fall back to a full-D block
    (allowed since it equals the array dim; one masked store column, but no
    wrapper-side pad pass over HBM)."""
    if D % 128 != 0:
        # TODO(synk): for very large non-128-multiple D this single block could
        # exceed VMEM; pad D upstream in that case.
        return D
    best = 128
    t = 128
    while t <= min(D, lane_tile):
        if D % t == 0:
            need = N * N * 2 + 4 * (N * t * 4)  # A(bf16) + 2x in + 2x out (f32)
            if need <= vmem_budget_bytes:
                best = t
        t += 128
    return best


def group_projection_pallas(x, a_total_bf16, lane_tile=512):
    """x: [B, N, D] float32 (native module layout, no wrapper reshuffle);
    a_total_bf16: [N, N] bfloat16 mixing matrix folded over all NUM_ITER steps."""
    B, N, D = x.shape
    assert a_total_bf16.shape == (N, N)

    # Conservative budget so the tiling is safe on v7x (64 MiB VMEM per TC);
    # v5e/v6e (128 MiB) simply end up with the same roofline-saturating tile.
    vmem_budget = 28 << 20
    d_tile = _pick_d_tile(N, D, lane_tile, vmem_budget)
    num_d = D // d_tile

    # Both grid axes are independent ("parallel"); with B >= 2 there are at
    # least two balanced steps, so v7x's two TensorCores both get work.
    grid = (B, num_d)

    vmem_bytes = N * N * 2 + 4 * (N * d_tile * 4)
    vmem_limit = int(min(2 * vmem_bytes + (8 << 20), 56 << 20))

    return pl.pallas_call(
        _group_projection_kernel,
        out_shape=jax.ShapeDtypeStruct((B, N, D), x.dtype),
        grid=grid,
        in_specs=[
            # Block-invariant folded matrix: constant index_map, single-buffered.
            pl.BlockSpec((N, N), lambda b, j: (0, 0),
                         pipeline_mode=pl.Buffered(1)),
            # Native [B, N, D]: one batch element x one lane tile per step.
            pl.BlockSpec((1, N, d_tile), lambda b, j: (b, 0, j)),
        ],
        out_specs=pl.BlockSpec((1, N, d_tile), lambda b, j: (b, 0, j)),
        compiler_params=pltpu.CompilerParams(
            dimension_semantics=("parallel", "parallel"),
            vmem_limit_bytes=vmem_limit),
    )(a_total_bf16, x)


# ---------------------------------------------------------------------------
# Synthetic (deterministic) projection + glue to fold the per-iteration update
# ---------------------------------------------------------------------------
class SyntheticCentroidProj:
    """delta = step(ite) * W @ group_x, with W pulling particles to centroid."""

    def __init__(self, num_particles, base_step):
        self.num_particles = num_particles
        self.base_step = float(base_step)
        gp = num_particles
        self.W = (np.ones((gp, gp), np.float64) / gp
                  - np.eye(gp, dtype=np.float64))

    def step(self, ite):
        return self.base_step / (ite + 1.0)

    def get_delta_x(self, group_x, ite):  # numpy reference path
        return self.step(ite) * np.einsum("pq,gqd->gpd", self.W, group_x)


def build_total_matrix(projs, groups_list, N, num_iter):
    """Fold gather -> W -> scatter-add of every proj/group and every outer
    iteration into ONE exact N x N mixing matrix (built in f64)."""
    total = np.eye(N, dtype=np.float64)
    for ite in range(num_iter):
        M = np.eye(N, dtype=np.float64)
        for proj, groups in zip(projs, groups_list):
            for gidx in groups:
                idx = np.asarray(gidx)
                M[np.ix_(idx, idx)] += proj.step(ite) * proj.W
        total = M @ total  # upd_x <- M_ite @ upd_x
    return total


def reference_forward(x, projs, groups_list, num_iter):
    """Direct transliteration of the PyTorch forward (numpy, f64)."""
    upd_x = np.array(x, dtype=np.float64)
    B, N, D = upd_x.shape
    for ite in range(num_iter):
        delta_x = np.zeros_like(upd_x)
        for proj, groups in zip(projs, groups_list):
            gp = proj.num_particles
            group_x = np.zeros((len(groups) * B, gp, D), dtype=np.float64)
            for j, gidx in enumerate(groups):
                group_x[j * B:(j + 1) * B, :, :] = upd_x[:, gidx, :]
            delta_g = proj.get_delta_x(group_x, ite)
            for j, gidx in enumerate(groups):
                delta_x[:, gidx, :] += delta_g[j * B:(j + 1) * B, :, :]
        upd_x = upd_x + delta_x
    return upd_x


if __name__ == "__main__":
    # batch, num_particles, dimension (D a multiple of 128 -> dense lane stores)
    B, N, D = 2, 16, 128

    key = jax.random.PRNGKey(0)
    x = jax.random.normal(key, (B, N, D), dtype=jnp.float32)

    # Deterministic projections + groups (each group list partitions particles).
    projs = [SyntheticCentroidProj(4, 0.5), SyntheticCentroidProj(8, 0.25)]
    groups_list = [
        [[0, 1, 2, 3], [4, 5, 6, 7], [8, 9, 10, 11], [12, 13, 14, 15]],
        [[0, 2, 4, 6, 8, 10, 12, 14], [1, 3, 5, 7, 9, 11, 13, 15]],
    ]

    # Exact fold in f64, shipped to the kernel as bf16 once (no per-step cast).
    a_total_f64 = build_total_matrix(projs, groups_list, N, NUM_ITER)
    a_total = jnp.asarray(a_total_f64, dtype=jnp.bfloat16)

    out = jax.block_until_ready(group_projection_pallas(x, a_total))

    ref = reference_forward(np.asarray(x), projs, groups_list, NUM_ITER)
    # Tolerance reflects the deliberate bf16 MXU operands (f32 accumulate);
    # the iteration fold itself is exact.
    np.testing.assert_allclose(np.asarray(out), ref, rtol=2e-2, atol=3e-2)

    print("KERNEL_OK")
</pallas_src>

<mosaic_0001>
module attributes {stable_mosaic.version = 11 : i64} {
  func.func @_group_projection_kernel(%arg0: i32, %arg1: i32, %arg2: memref<16x16xbf16, #tpu.memory_space<vmem>>, %arg3: memref<1x16x128xf32, #tpu.memory_space<vmem>>, %arg4: memref<1x16x128xf32, #tpu.memory_space<vmem>>) attributes {dimension_semantics = [#tpu.dimension_semantics<parallel>, #tpu.dimension_semantics<parallel>], iteration_bounds = array<i64: 2, 1>, scalar_prefetch = 0 : i64, scratch_operands = 0 : i64, tpu.core_type = #tpu.core_type<tc>, window_params = [{pipeline_mode = #tpu.pipeline_mode<synchronous>, transform_indices = @transform_0, window_bounds = array<i64: 16, 16>}, {transform_indices = @transform_1, window_bounds = array<i64: 1, 16, 128>}, {transform_indices = @transform_2, window_bounds = array<i64: 1, 16, 128>}]} {
    %c0 = arith.constant 0 : index
    %c0_0 = arith.constant 0 : index
    %c0_1 = arith.constant 0 : index
    %0 = vector.load %arg3[%c0, %c0_0, %c0_1] : memref<1x16x128xf32, #tpu.memory_space<vmem>>, vector<1x16x128xf32>
    %1 = vector.shape_cast %0 : vector<1x16x128xf32> to vector<16x128xf32>
    %2 = arith.truncf %1 : vector<16x128xf32> to vector<16x128xbf16>
    %c0_2 = arith.constant 0 : index
    %c0_3 = arith.constant 0 : index
    %3 = vector.load %arg2[%c0_2, %c0_3] : memref<16x16xbf16, #tpu.memory_space<vmem>>, vector<16x16xbf16>
    %cst = arith.constant dense<0.000000e+00> : vector<16x128xf32>
    %4 = tpu.matmul %3, %2, %cst {dimension_numbers = #tpu.dot_dimension_numbers<[1], [0], [0], [1], [0, 0, 1, 1], [], []>} : vector<16x16xbf16>, vector<16x128xbf16>, vector<16x128xf32> -> vector<16x128xf32>
    %c0_4 = arith.constant 0 : index
    %c0_5 = arith.constant 0 : index
    %c0_6 = arith.constant 0 : index
    %5 = vector.load %arg4[%c0_4, %c0_5, %c0_6] : memref<1x16x128xf32, #tpu.memory_space<vmem>>, vector<1x16x128xf32>
    %6 = vector.shape_cast %5 : vector<1x16x128xf32> to vector<16x128xf32>
    %7 = vector.shape_cast %4 : vector<16x128xf32> to vector<1x16x128xf32>
    tpu.vector_store %arg4[%c0_4, %c0_5, %c0_6], %7 {strides = array<i32>} : memref<1x16x128xf32, #tpu.memory_space<vmem>>, vector<1x16x128xf32>,
    return
  }
  func.func @transform_0(%arg0: i32, %arg1: i32) -> (i32, i32) {
    %c0_i32 = arith.constant 0 : i32
    %c0_i32_0 = arith.constant 0 : i32
    %c0_i32_1 = arith.constant 0 : i32
    return %c0_i32, %c0_i32_0 : i32, i32
  }
  func.func @transform_1(%arg0: i32, %arg1: i32) -> (i32, i32, i32) {
    %c0_i32 = arith.constant 0 : i32
    %c0_i32_0 = arith.constant 0 : i32
    return %arg0, %c0_i32, %arg1 : i32, i32, i32
  }
  func.func @transform_2(%arg0: i32, %arg1: i32) -> (i32, i32, i32) {
    %c0_i32 = arith.constant 0 : i32
    %c0_i32_0 = arith.constant 0 : i32
    return %arg0, %c0_i32, %arg1 : i32, i32, i32
  }
}

</mosaic_0001>

<bundles_post_ra>
// kernel: tpu_custom_call.1
= control target key start
LH: loop header
LB: loop body
LE: loop exit
PB: predicated region body
PF: predicated region fallthrough
CT: control target
= control target key end

     0   :  { %7 = vsyncpa [#allocation3], 0  ;;  %s866_s0 = inlined_call_operand.hbm [shape: bf16[16,16], index: 0, kind: input, shape index: {}]   ;;  %s867_s1 = inlined_call_operand.hbm [shape: f32[2,16,128], index: 1, kind: input, shape index: {}]   ;;  %s868_s2 = inlined_call_operand.hbm [shape: f32[2,16,128], index: 2, kind: output, shape index: {}]  }
   0x1   :  { %8 = vsyncpa [#allocation6], 0 }
   0x2   :  { %10 = vsyncpa [#allocation6 + $0x1], 0 }
   0x3   :  { %11 = vsyncpa [#allocation4], 0 }
   0x4   :  { %13 = vsyncpa [#allocation4 + $0x1], 0  ;;  %s647_s9 = smov 0   ;;  %s649_s10 = smov 0  }
   0x5   :  { %s651_s11 = smov 0   ;;  %s653_s12 = smov 0  }
   0x6   :  { %s655_s13 = smov 0   ;;  %s657_s14 = smov 0  }
   0x7 LB: > { %s364_s15 = sadd.s32 4294967295, %s619_s14   ;;  %s365_s16 = sadd.s32 4294967294, %s619_s14   ;;  %s619_s14 = sphi %s657_s14, %s19_s14   ;;  %s615_s13 = sphi %s655_s13, %s892_s13   ;;  %s611_s12 = sphi %s653_s12, %s891_s12   ;;  %s607_s11 = sphi %s651_s11, %s890_s11   ;;  %s603_s10 = sphi %s649_s10, %s889_s10   ;;  %s599_s9 = sphi %s647_s9, %s888_s9  }
   0x8   : > { %p74_p0 = scmp.ne.s32.totalorder %s603_s10, %s599_s9  ;;  %p681_p1 = scmp.eq.s32.totalorder %s364_s15, 0 }
   0x9   : > { %p685_p2 = scmp.eq.s32.totalorder %s364_s15, 1  ;;  %p106_p3 = scmp.eq.s32.totalorder %s365_s16, 1 }
   0xa   : > { %s873_s17 = scalar_select %p681_p1, 1, 0 }
   0xb   : > { %s874_s18 = scalar_select %p685_p2, 1, 0 }
   0xc   : > { %p691_p4 = por %p681_p1, %p74_p0  ;;  %p366_p5 = scmp.ge.s32.totalorder %s619_s14, 1 }
   0xd   : > { %p696_p6 = por %p106_p3, %p74_p0  ;;  %p113_p7 = scmp.lt.s32.totalorder %s619_s14, 3 }
   0xe   : > { %s875_s19 = scalar_select %p691_p4, 1, 0 }
   0xf   : > { %s876_s20 = scalar_select %p696_p6, 1, 0 }
  0x10   : > { %p701_p8 = pnand %p366_p5, %p113_p7  ;;  %s621_s22 = smov [#allocation2]  }
  0x11   : > { %s125_s23 = sshll.u32 %s621_s22, 4  ;;  %s31_s25 = sadd.s32 1, %s615_s13  ;;  %s126_s23 = int_to_ptr.vmem [resolvable:$true] %s125_s23 }
  0x12   : > { %s877_s21 = scalar_select %p701_p8, 1, 0 }
  0x13   : > { %p401_p9 = pneg %p701_p8  ;;  %s475_s28 = scalar_lea.hbm %s866_s0, 128 }
  0x14   : > { %p476_p12 = scmp.ne.s32.totalorder %s866_s0, %s475_s28  ;;  %p482_p5 = scmp.lt.u32.totalorder %s475_s28, %s866_s0 }
  0x15   : > { %p710_p11 = pnand %p401_p9, %p681_p1 }
  0x17   : > { %p477_p13 = pneg %p710_p11 }
  0x19   : > { %p478_p0 = pnand %p477_p13, %p476_p12 }
  0x1b   : > { %p479_p3 = pneg %p478_p0 }
  0x1d   : > { %p484_p7 = pnand %p482_p5, %p479_p3 }
  0x1f   : > { %487 = shalt.err (!%p484_p7)
}
  0x20   : > { %s488_s5 = scalar_lea.vmem %s126_s23, 128  ;;  %p496_p4 = scmp.lt.s32.totalorder %s126_s23, %s126_s23 }
  0x21   : > { %p489_p9 = scmp.ne.s32.totalorder %s126_s23, %s488_s5  ;;  %p497_p1 = scmp.lt.s32.totalorder %s488_s5, %s488_s5 }
  0x23   : > { %p491_p10 = pnand %p489_p9, %p477_p13  ;;  %p498_p8 = por %p497_p1, %p496_p4 }
  0x25   : > { %p492_p6 = pneg %p491_p10 }
  0x27   : > { %p499_p2 = pnand %p498_p8, %p492_p6 }
  0x29   : > { %502 = shalt.err (!%p499_p2)
}
  0x2a   : > { %s622_s6 = smov 64   ;;  %s623_s7 = smov 4  }
  0x2b   : > { %404 = dma.hbm_to_vmem [thread:$0]  (!%p710_p11), %s866_s0, 128, %s126_s23, [#allocation3], %s622_s6, %s622_s6, %s623_s7  }
  0x2c   : > { %p33_p1 = scmp.ge.s32.totalorder %s31_s25, 2  ;;  %s61_s16 = sadd.s32 1, %s607_s11 }
  0x2d   : > { %p68_p2 = scmp.ne.s32.totalorder %s607_s11, %s603_s10  ;;  %p69_p4 = scmp.eq.s32.totalorder %s619_s14, 0 }
  0x2e   : > { %s894_s25 = smov (%p33_p1, %s31_s25), 0  ;;  %p880_p8 = scmp.ne.s32.totalorder %s874_s18, 0 }
  0x2f   : > { %p737_p6 = por %p69_p4, %p68_p2  ;;  %s56_s24 = ssub.s32 %s615_s13, %s894_s25 }
  0x30   : > { %p743_p10 = por %p880_p8, %p68_p2  ;;  %p414_p12 = scmp.lt.s32.totalorder %s619_s14, 2 }
  0x31   : > { %p59_p11 = scmp.eq.s32.totalorder %s56_s24, 0  ;;  %s139_s23 = sand.u32 1, %s607_s11  }
  0x32   : > { %s369_s27 = sshll.u32 %s139_s23, 4  ;;  %s383_s29 = sshll.u32 %s615_s13, 8 }
  0x33   : > { %s752_s28 = scalar_select %p59_p11, %s607_s11, %s61_s16  }
  0x34   : > { %s758_s4 = scalar_lea.hbm %s867_s1, %s383_s29  ;;  %s143_s18 = scalar_lea.vmem [#allocation5], %s369_s27 }
  0x35   : > { %s151_s5 = sshll.u32 %s143_s18, 4  ;;  %p764_p13 = pnand %p414_p12, %p737_p6  ;;  %s760_s5 = int_to_ptr.vmem [resolvable:$true] %s151_s5 }
  0x36   : > { %s768_s7 = scalar_lea.sflag [#allocation6], %s139_s23  ;;  %s503_s8 = scalar_lea.hbm %s758_s4, 256 }
  0x37   : > { %p504_p0 = scmp.ne.s32.totalorder %s758_s4, %s503_s8  ;;  %p505_p3 = pneg %p764_p13 }
  0x38   : > { %s508_s22 = scalar_lea.hbm %s867_s1, 512  ;;  %p509_p9 = scmp.lt.u32.totalorder %s758_s4, %s867_s1 }
  0x39   : > { %p506_p5 = pnand %p505_p3, %p504_p0  ;;  %p510_p1 = scmp.lt.u32.totalorder %s508_s22, %s503_s8 }
  0x3a   : > { %p512_p4 = scmp.lt.u32.totalorder %s503_s8, %s758_s4 }
  0x3b   : > { %p507_p7 = pneg %p506_p5  ;;  %p511_p2 = por %p510_p1, %p509_p9 }
  0x3d   : > { %p513_p6 = por %p512_p4, %p511_p2 }
  0x3f   : > { %p514_p8 = pnand %p513_p6, %p507_p7 }
  0x41   : > { %517 = shalt.err (!%p514_p8)
}
  0x42   : > { %s518_s23 = scalar_lea.vmem %s760_s5, 256  ;;  %s624_s29 = smov [#allocation5]  }
  0x43   : > { %p519_p12 = scmp.ne.s32.totalorder %s760_s5, %s518_s23  ;;  %s523_s30 = sshll.u32 %s624_s29, 4  ;;  %s524_s30 = int_to_ptr.vmem [resolvable:$false] %s523_s30 }
  0x44   : > { %s525_s3 = scalar_lea.vmem %s524_s30, 512  ;;  %p526_p5 = scmp.lt.s32.totalorder %s760_s5, %s524_s30 }
  0x45   : > { %p521_p11 = pnand %p519_p12, %p505_p3  ;;  %p527_p9 = scmp.lt.s32.totalorder %s525_s3, %s518_s23 }
  0x47   : > { %p522_p0 = pneg %p521_p11  ;;  %p528_p1 = por %p527_p9, %p526_p5 }
  0x49   : > { %p529_p2 = pnand %p528_p1, %p522_p0 }
  0x4b   : > { %532 = shalt.err (!%p529_p2)
}
  0x4c   : > { %s625_s18 = smov 128   ;;  %s626_s8 = smov 8  }
  0x4d   : > { %408 = dma.hbm_to_vmem [thread:$0]  (!%p764_p13), %s758_s4, 256, %s760_s5, %s768_s7, %s625_s18, %s625_s18, %s626_s8  }
  0x4e   : > { %p883_p3 = scmp.ne.s32.totalorder %s877_s21, 0 }
  0x4f   : > { %p884_p7 = scmp.ne.s32.totalorder (!%p883_p3), %s873_s17, 0 }
  0x50   : > { %163 = sbr.rel (%p883_p3) target bundleno = 327 (0x147), region = 28 }
  0x57   : > { %586 = dma.done.wait (%p884_p7), [#allocation3], 128  }
  0x58   : > { %588 = vsyncadd (%p884_p7), [#allocation3], 4294967168  ;;  %s803_s15 = sand.u32 1, %s603_s10   ;;  %p885_p4 = scmp.ne.s32.totalorder %s875_s19, 0 }
  0x59   : > { %s374_s16 = sshll.u32 %s803_s15, 4  ;;  %s170_s22 = scalar_lea.sflag [#allocation6], %s803_s15 }
  0x5a   : > { %s173_s24 = scalar_lea.vmem [#allocation5], %s374_s16 }
  0x5b   : > { %590 = dma.done.wait (%p885_p4), %s170_s22, 256  }
  0x5c   : > { %592 = vsyncadd (%p885_p4), %s170_s22, 4294967040  ;;  %v627_v0 = vmov 0.0   ;;  %vm628_vm0 = vmmov 0   ;;  %v195_v1 = vld [vmem:[%s173_s24] sm:$0xff]  ;;  %v196_v2 = vld [vmem:[%s173_s24 + $0x8] sm:$0xff]  ;;  %vm205_vm1 = vcmask 130048  }
  0x5d   : > { %387 = vmatprep.subr.bf16.mxu0 %v627_v0  ;;  %389 = vmatprep.mubr.msk.bf16.mxu0 %vm628_vm0, %v627_v0  ;;  %v197_v3 = vpack.c.bf16 %v196_v2, %v195_v1  ;;  %v474_v4 = vld [vmem:[#allocation2] sm:$0xff]   ;;  %s193_s17 = scalar_lea.vmem [#allocation7], %s374_s16  ;;  %s384_s4 = sshll.u32 %s611_s12, 8 }
  0x5e   : > { %s267_s21 = sshll.u32 %s193_s17, 4  ;;  %s817_s6 = scalar_lea.hbm %s868_s2, %s384_s4  ;;  %s812_s21 = int_to_ptr.vmem [resolvable:$true] %s267_s21 }
  0x5f   : > { %388 = vmatpush3.bf16.msra.mxu0 %v197_v3  ;;  %s253_s7 = scalar_lea.sflag [#allocation4], %s803_s15  ;;  %s533_s27 = scalar_lea.vmem %s812_s21, 256 }
  0x60   : > { %p534_p13 = scmp.ne.s32.totalorder %s812_s21, %s533_s27  ;;  %s629_s12 = smov [#allocation7]  }
  0x61   : > { %s537_s23 = sshll.u32 %s629_s12, 4  ;;  %s538_s23 = int_to_ptr.vmem [resolvable:$false] %s537_s23 }
  0x62   : > { %390 = vmatmul.mubr.msk.bf16.vlgmr.msra.gmra.mrb[0].mxu0 %vm205_vm1, %v474_v4  ;;  %p535_p6 = pnand %p534_p13, %p743_p10  ;;  %s539_s29 = scalar_lea.vmem %s538_s23, 512 }
  0x63   : > { %p540_p12 = scmp.lt.s32.totalorder %s812_s21, %s538_s23  ;;  %p541_p11 = scmp.lt.s32.totalorder %s539_s29, %s533_s27 }
  0x64   : > { %p536_p8 = pneg %p535_p6 }
  0x65   : > { %p542_p0 = por %p541_p11, %p540_p12 }
  0x67   : > { %p543_p5 = pnand %p542_p0, %p536_p8 }
 0x135   : > { %v243_v5 = vpop.f32.mrb[0].mxu0 }
 0x136   : > { %250 = vst [vmem:[%s193_s17] sm:$0xff] %v243_v5  ;;  %v391_v6 = vpop.f32.mrb[1].mxu0 }
 0x137   : > { %v246_v7 = vpop.f32.mrb[2].mxu0 }
 0x138   : > { %251 = vst [vmem:[%s193_s17 + $0x8] sm:$0xff] %v246_v7  ;;  %v392_v8 = vpop.f32.mrb[3].mxu0 }
 0x139   : > { %546 = shalt.err (!%p543_p5)
}
 0x13a   : > { %s547_s30 = scalar_lea.hbm %s817_s6, 256  ;;  %s551_s8 = scalar_lea.hbm %s868_s2, 512 }
 0x13b   : > { %p548_p9 = scmp.ne.s32.totalorder %s817_s6, %s547_s30  ;;  %p552_p3 = scmp.lt.u32.totalorder %s817_s6, %s868_s2 }
 0x13c   : > { %p553_p7 = scmp.lt.u32.totalorder %s551_s8, %s547_s30  ;;  %p555_p13 = scmp.lt.u32.totalorder %s547_s30, %s817_s6 }
 0x13d   : > { %p549_p1 = pnand %p548_p9, %p743_p10 }
 0x13e   : > { %p554_p4 = por %p553_p7, %p552_p3 }
 0x13f   : > { %p550_p2 = pneg %p549_p1 }
 0x140   : > { %p556_p6 = por %p555_p13, %p554_p4 }
 0x142   : > { %p557_p8 = pnand %p556_p6, %p550_p2 }
 0x144   : > { %560 = shalt.err (!%p557_p8)
}
 0x145   : > { %s630_s24 = smov 128   ;;  %s631_s17 = smov 8  }
 0x146   : > { %399 = dma.vmem_to_hbm [thread:$0]  (%p743_p10), %s812_s21, 256, %s817_s6, %s253_s7, %s630_s24, %s630_s24, %s631_s17  }
 0x147 PF: > { %s282_s4 = sand.u32 1, %s599_s9   ;;  %p886_p12 = scmp.ne.s32.totalorder %s876_s20, 0 }
 0x148   : > { %p887_p11 = scmp.ge.s32.totalorder %s619_s14, 2  ;;  %s283_s19 = scalar_lea.sflag [#allocation4], %s282_s4 }
 0x14a   : > { %p410_p0 = pnand %p887_p11, %p886_p12 }
 0x14c   : > { %594 = dma.done.wait (!%p410_p0), %s283_s19, 256  }
 0x14d   : > { %596 = vsyncadd (!%p410_p0), %s283_s19, 4294967040  ;;  %s19_s14 = sadd.s32 1, %s619_s14   ;;  %s888_s9 = smov %s603_s10 }
 0x14e   : > { %p16_p5 = scmp.ge.s32.totalorder %s19_s14, 4   ;;  %s889_s10 = smov %s607_s11 }
 0x14f   : > { %s890_s11 = smov %s752_s28  ;;  %s891_s12 = smov %s615_s13 }
 0x150   : > { %s892_s13 = smov %s894_s25  ;;  %18 = sbr.rel (!%p16_p5) target bundleno = 7 (0x7), region = 78 }
 0x157   :  { %288 = vsyncpa [#allocation3], 1 }
 0x158   :  { %290 = vsyncpa [#allocation3 + $0x1], 1 }
 0x159   :  { %291 = vsyncpa [#allocation6], 1 }
 0x15a   :  { %293 = vsyncpa [#allocation6 + $0x1], 1 }
 0x15b   :  { %294 = vsyncpa [#allocation4], 1 }
 0x15c   :  { %296 = vsyncpa [#allocation4 + $0x1], 1 }

</bundles_post_ra>
